<compile_context>
chip_gen: v7x
topology: tpu7x:2x2x1
jax: 0.10.0
libtpu: 0.0.40
codegen_flags: <defaults>
</compile_context>

<pallas_src>
import functools

import jax
import jax.numpy as jnp
from jax.experimental import pallas as pl
from jax.experimental.pallas import tpu as pltpu

H = 64  # hidden width


def _round_up(x, m):
    return ((x + m - 1) // m) * m


def mlp_kernel(x_ref, w1_ref, b1_ref, w2_ref, b2_ref, w3_ref, b3_ref, o_ref):
    # x_ref: (2, TB); weights in torch layout (out, in); biases (out, 1); o_ref: (2, TB).
    x = x_ref[...]                                         # (2, TB) f32
    w1 = w1_ref[...]                                       # (64, 2)

    # ----- Layer 1 (Linear 2->64) on the VPU: K=2 would waste a full MXU pass. -----
    h1 = (w1[:, 0:1] * x[0:1, :] + w1[:, 1:2] * x[1:2, :]) + b1_ref[...]   # (64, TB)
    h1 = jnp.maximum(h1, 0.0)                              # ReLU

    # ----- Layer 2 (Linear 64->64) on the MXU, lane-dense N=TB. -----
    # (v5e option: cast w2/h1 to bf16 here to halve MXU passes; kept f32 for exact parity.)
    h2 = jnp.dot(w2_ref[...], h1, preferred_element_type=jnp.float32) + b2_ref[...]
    h2 = jnp.maximum(h2, 0.0)                              # (64, TB)

    # ----- Layer 3 (Linear 64->2): result lands in a lane-dense (2, TB) slab. -----
    y = jnp.dot(w3_ref[...], h2, preferred_element_type=jnp.float32) + b3_ref[...]
    o_ref[...] = y.astype(o_ref.dtype)                     # unmasked full-lane store


@functools.partial(jax.jit, static_argnames=("tb",))
def frequencies_detector(x, params, tb=1024):
    """x: (B, 2) f32; params in torch layout (W: (out, in), b: (out,)). Returns (B, 2)."""
    w1, b1, w2, b2, w3, b3 = params
    B = x.shape[0]

    # Batch tile: multiple of 128 (lane width); pad the batch up to a tile multiple.
    tb = _round_up(max(tb, 128), 128)
    TB = min(tb, _round_up(max(B, 1), 128))
    B_pad = _round_up(B, TB)

    # Feature-major (transposed) layout so batch lands on the lane axis.
    x_t = jnp.zeros((2, B_pad), x.dtype).at[:, :B].set(x.T)
    b1c, b2c, b3c = b1.reshape(H, 1), b2.reshape(H, 1), b3.reshape(2, 1)

    const = lambda i: (0, 0)  # weights/biases: VMEM-resident, fetched once
    out_t = pl.pallas_call(
        mlp_kernel,
        out_shape=jax.ShapeDtypeStruct((2, B_pad), jnp.float32),
        grid=(B_pad // TB,),
        in_specs=[
            pl.BlockSpec((2, TB), lambda i: (0, i)),       # x tile (batch on lanes)
            pl.BlockSpec((H, 2), const),                   # W1
            pl.BlockSpec((H, 1), const),                   # b1
            pl.BlockSpec((H, H), const),                   # W2
            pl.BlockSpec((H, 1), const),                   # b2
            pl.BlockSpec((2, H), const),                   # W3
            pl.BlockSpec((2, 1), const),                   # b3
        ],
        out_specs=pl.BlockSpec((2, TB), lambda i: (0, i)),
        compiler_params=pltpu.CompilerParams(
            dimension_semantics=("parallel",),             # shard batch tiles across TCs (v7x)
        ),
    )(x_t, w1, b1c, w2, b2c, w3, b3c)

    return out_t[:, :B].T


def init_params(key):
    # Deterministic synthetic init mimicking nn.Linear's U(-1/sqrt(fan_in), 1/sqrt(fan_in)),
    # stored in torch layout: W (out_features, in_features), b (out_features,).
    def linear(key, fan_in, fan_out):
        kw, kb = jax.random.split(key)
        bound = 1.0 / float(fan_in) ** 0.5
        w = jax.random.uniform(kw, (fan_out, fan_in), jnp.float32, -bound, bound)
        b = jax.random.uniform(kb, (fan_out,), jnp.float32, -bound, bound)
        return w, b

    k1, k2, k3 = jax.random.split(key, 3)
    w1, b1 = linear(k1, 2, H)
    w2, b2 = linear(k2, H, H)
    w3, b3 = linear(k3, H, 2)
    return (w1, b1, w2, b2, w3, b3)


def reference(x, params):
    # Pure-JAX reference of the torch forward: Linear -> ReLU -> Linear -> ReLU -> Linear.
    w1, b1, w2, b2, w3, b3 = params
    hp = jax.lax.Precision.HIGHEST
    h1 = jnp.maximum(jnp.dot(x, w1.T, precision=hp) + b1, 0.0)
    h2 = jnp.maximum(jnp.dot(h1, w2.T, precision=hp) + b2, 0.0)
    return jnp.dot(h2, w3.T, precision=hp) + b3


if __name__ == "__main__":
    key = jax.random.PRNGKey(0)
    kx, kp = jax.random.split(key)
    params = init_params(kp)

    # Case 1: tiny batch (pads to one 128-wide tile).  Case 2: multi-tile grid + tail padding.
    for batch, tb in ((8, 1024), (200, 128)):
        x = jax.random.normal(jax.random.fold_in(kx, batch), (batch, 2), dtype=jnp.float32)
        out = jax.block_until_ready(frequencies_detector(x, params, tb=tb))
        ref = reference(x, params)
        assert out.shape == (batch, 2)
        assert jnp.allclose(out, ref, atol=1e-4, rtol=1e-4), f"mismatch vs reference (B={batch})"

    print("KERNEL_OK")
</pallas_src>

<mosaic_0001>
module attributes {stable_mosaic.version = 11 : i64} {
  func.func @mlp_kernel(%arg0: i32, %arg1: memref<2x128xf32, #tpu.memory_space<vmem>>, %arg2: memref<64x2xf32, #tpu.memory_space<vmem>>, %arg3: memref<64x1xf32, #tpu.memory_space<vmem>>, %arg4: memref<64x64xf32, #tpu.memory_space<vmem>>, %arg5: memref<64x1xf32, #tpu.memory_space<vmem>>, %arg6: memref<2x64xf32, #tpu.memory_space<vmem>>, %arg7: memref<2x1xf32, #tpu.memory_space<vmem>>, %arg8: memref<2x128xf32, #tpu.memory_space<vmem>>) attributes {dimension_semantics = [#tpu.dimension_semantics<parallel>], iteration_bounds = array<i64: 1>, scalar_prefetch = 0 : i64, scratch_operands = 0 : i64, tpu.core_type = #tpu.core_type<tc>, window_params = [{transform_indices = @transform_0, window_bounds = array<i64: 2, 128>}, {pipeline_mode = #tpu.pipeline_mode<synchronous>, transform_indices = @transform_1, window_bounds = array<i64: 64, 2>}, {pipeline_mode = #tpu.pipeline_mode<synchronous>, transform_indices = @transform_2, window_bounds = array<i64: 64, 1>}, {pipeline_mode = #tpu.pipeline_mode<synchronous>, transform_indices = @transform_3, window_bounds = array<i64: 64, 64>}, {pipeline_mode = #tpu.pipeline_mode<synchronous>, transform_indices = @transform_4, window_bounds = array<i64: 64, 1>}, {pipeline_mode = #tpu.pipeline_mode<synchronous>, transform_indices = @transform_5, window_bounds = array<i64: 2, 64>}, {pipeline_mode = #tpu.pipeline_mode<synchronous>, transform_indices = @transform_6, window_bounds = array<i64: 2, 1>}, {transform_indices = @transform_7, window_bounds = array<i64: 2, 128>}]} {
    %c0 = arith.constant 0 : index
    %c0_0 = arith.constant 0 : index
    %0 = vector.load %arg1[%c0, %c0_0] : memref<2x128xf32, #tpu.memory_space<vmem>>, vector<2x128xf32>
    %c0_1 = arith.constant 0 : index
    %c0_2 = arith.constant 0 : index
    %1 = vector.load %arg2[%c0_1, %c0_2] : memref<64x2xf32, #tpu.memory_space<vmem>>, vector<64x2xf32>
    %2 = vector.extract_strided_slice %1 {offsets = [0, 0], sizes = [64, 1], strides = [1, 1]} : vector<64x2xf32> to vector<64x1xf32>
    %3 = vector.extract_strided_slice %0 {offsets = [0, 0], sizes = [1, 128], strides = [1, 1]} : vector<2x128xf32> to vector<1x128xf32>
    %4 = vector.broadcast %2 : vector<64x1xf32> to vector<64x128xf32>
    %5 = vector.broadcast %3 : vector<1x128xf32> to vector<64x128xf32>
    %6 = arith.mulf %4, %5 : vector<64x128xf32>
    %7 = vector.extract_strided_slice %1 {offsets = [0, 1], sizes = [64, 1], strides = [1, 1]} : vector<64x2xf32> to vector<64x1xf32>
    %8 = vector.extract_strided_slice %0 {offsets = [1, 0], sizes = [1, 128], strides = [1, 1]} : vector<2x128xf32> to vector<1x128xf32>
    %9 = vector.broadcast %7 : vector<64x1xf32> to vector<64x128xf32>
    %10 = vector.broadcast %8 : vector<1x128xf32> to vector<64x128xf32>
    %11 = arith.mulf %9, %10 : vector<64x128xf32>
    %12 = arith.addf %6, %11 : vector<64x128xf32>
    %c0_3 = arith.constant 0 : index
    %c0_4 = arith.constant 0 : index
    %13 = vector.load %arg3[%c0_3, %c0_4] : memref<64x1xf32, #tpu.memory_space<vmem>>, vector<64x1xf32>
    %14 = vector.broadcast %13 : vector<64x1xf32> to vector<64x128xf32>
    %15 = arith.addf %12, %14 : vector<64x128xf32>
    %cst = arith.constant 0.000000e+00 : f32
    %16 = vector.broadcast %cst : f32 to vector<64x128xf32>
    %17 = arith.maximumf %15, %16 : vector<64x128xf32>
    %c0_5 = arith.constant 0 : index
    %c0_6 = arith.constant 0 : index
    %18 = vector.load %arg4[%c0_5, %c0_6] : memref<64x64xf32, #tpu.memory_space<vmem>>, vector<64x64xf32>
    %cst_7 = arith.constant dense<0.000000e+00> : vector<64x128xf32>
    %19 = tpu.matmul %18, %17, %cst_7 {dimension_numbers = #tpu.dot_dimension_numbers<[1], [0], [0], [1], [0, 0, 1, 1], [], []>} : vector<64x64xf32>, vector<64x128xf32>, vector<64x128xf32> -> vector<64x128xf32>
    %c0_8 = arith.constant 0 : index
    %c0_9 = arith.constant 0 : index
    %20 = vector.load %arg5[%c0_8, %c0_9] : memref<64x1xf32, #tpu.memory_space<vmem>>, vector<64x1xf32>
    %21 = vector.broadcast %20 : vector<64x1xf32> to vector<64x128xf32>
    %22 = arith.addf %19, %21 : vector<64x128xf32>
    %cst_10 = arith.constant 0.000000e+00 : f32
    %23 = vector.broadcast %cst_10 : f32 to vector<64x128xf32>
    %24 = arith.maximumf %22, %23 : vector<64x128xf32>
    %c0_11 = arith.constant 0 : index
    %c0_12 = arith.constant 0 : index
    %25 = vector.load %arg6[%c0_11, %c0_12] : memref<2x64xf32, #tpu.memory_space<vmem>>, vector<2x64xf32>
    %cst_13 = arith.constant dense<0.000000e+00> : vector<2x128xf32>
    %26 = tpu.matmul %25, %24, %cst_13 {dimension_numbers = #tpu.dot_dimension_numbers<[1], [0], [0], [1], [0, 0, 1, 1], [], []>} : vector<2x64xf32>, vector<64x128xf32>, vector<2x128xf32> -> vector<2x128xf32>
    %c0_14 = arith.constant 0 : index
    %c0_15 = arith.constant 0 : index
    %27 = vector.load %arg7[%c0_14, %c0_15] : memref<2x1xf32, #tpu.memory_space<vmem>>, vector<2x1xf32>
    %28 = vector.broadcast %27 : vector<2x1xf32> to vector<2x128xf32>
    %29 = arith.addf %26, %28 : vector<2x128xf32>
    %c0_16 = arith.constant 0 : index
    %c0_17 = arith.constant 0 : index
    %30 = vector.load %arg8[%c0_16, %c0_17] : memref<2x128xf32, #tpu.memory_space<vmem>>, vector<2x128xf32>
    tpu.vector_store %arg8[%c0_16, %c0_17], %29 {strides = array<i32>} : memref<2x128xf32, #tpu.memory_space<vmem>>, vector<2x128xf32>,
    return
  }
  func.func @transform_0(%arg0: i32) -> (i32, i32) {
    %c0_i32 = arith.constant 0 : i32
    %c0_i32_0 = arith.constant 0 : i32
    return %c0_i32, %arg0 : i32, i32
  }
  func.func @transform_1(%arg0: i32) -> (i32, i32) {
    %c0_i32 = arith.constant 0 : i32
    %c0_i32_0 = arith.constant 0 : i32
    %c0_i32_1 = arith.constant 0 : i32
    return %c0_i32, %c0_i32_0 : i32, i32
  }
  func.func @transform_2(%arg0: i32) -> (i32, i32) {
    %c0_i32 = arith.constant 0 : i32
    %c0_i32_0 = arith.constant 0 : i32
    %c0_i32_1 = arith.constant 0 : i32
    return %c0_i32, %c0_i32_0 : i32, i32
  }
  func.func @transform_3(%arg0: i32) -> (i32, i32) {
    %c0_i32 = arith.constant 0 : i32
    %c0_i32_0 = arith.constant 0 : i32
    %c0_i32_1 = arith.constant 0 : i32
    return %c0_i32, %c0_i32_0 : i32, i32
  }
  func.func @transform_4(%arg0: i32) -> (i32, i32) {
    %c0_i32 = arith.constant 0 : i32
    %c0_i32_0 = arith.constant 0 : i32
    %c0_i32_1 = arith.constant 0 : i32
    return %c0_i32, %c0_i32_0 : i32, i32
  }
  func.func @transform_5(%arg0: i32) -> (i32, i32) {
    %c0_i32 = arith.constant 0 : i32
    %c0_i32_0 = arith.constant 0 : i32
    %c0_i32_1 = arith.constant 0 : i32
    return %c0_i32, %c0_i32_0 : i32, i32
  }
  func.func @transform_6(%arg0: i32) -> (i32, i32) {
    %c0_i32 = arith.constant 0 : i32
    %c0_i32_0 = arith.constant 0 : i32
    %c0_i32_1 = arith.constant 0 : i32
    return %c0_i32, %c0_i32_0 : i32, i32
  }
  func.func @transform_7(%arg0: i32) -> (i32, i32) {
    %c0_i32 = arith.constant 0 : i32
    %c0_i32_0 = arith.constant 0 : i32
    return %c0_i32, %arg0 : i32, i32
  }
}

</mosaic_0001>

<bundles_post_ra>
// kernel: frequencies_detector.1
= control target key start
LH: loop header
LB: loop body
LE: loop exit
PB: predicated region body
PF: predicated region fallthrough
CT: control target
= control target key end

     0   :  { %v606_v0 = vmov 1   ;;  %v607_v7 = vmov 0   ;;  %vm259_vm0 = vcmask 523264   ;;  %v75_v30 = vlaneseq  ;;  %s768_s1 = inlined_call_operand.vmem [shape: f32[64,2], index: 1, kind: input, shape index: {}]   ;;  %s769_s2 = inlined_call_operand.vmem [shape: f32[64,1], index: 2, kind: input, shape index: {}]   ;;  %s770_s4 = inlined_call_operand.vmem [shape: f32[64,1], index: 4, kind: input, shape index: {}]   ;;  %s771_s6 = inlined_call_operand.vmem [shape: f32[2,1], index: 6, kind: input, shape index: {}]   ;;  %s772_s3 = inlined_call_operand.vmem [shape: f32[64,64], index: 3, kind: input, shape index: {}]   ;;  %s773_s0 = inlined_call_operand.vmem [shape: f32[2,128], index: 0, kind: input, shape index: {}]   ;;  %s774_s5 = inlined_call_operand.vmem [shape: f32[2,64], index: 5, kind: input, shape index: {}]   ;;  %s775_s7 = inlined_call_operand.vmem [shape: f32[2,128], index: 7, kind: output, shape index: {}]  }
   0x1   :  { %598 = vset.pattern.permute.xlu0 %v606_v0  ;;  %596 = vset.pattern.permute.xlu1 %v606_v0  ;;  %v29_v1 = vld [vmem:[%s768_s1 + $0x10] sm:$0xff]  ;;  %v27_v2 = vld [vmem:[%s768_s1] sm:$0xff]  ;;  %v28_v4 = vld [vmem:[%s768_s1 + $0x8] sm:$0xff]  ;;  %vm609_vm1 = vmmov 0  }
   0x2   :  { %96 = vperm.xlu0 %598, %v29_v1   ;;  %88 = vperm.xlu1 %596, %v27_v2   ;;  %v31_v3 = vld [vmem:[%s768_s1 + $0x20] sm:$0xff]  ;;  %v33_v5 = vld [vmem:[%s768_s1 + $0x30] sm:$0xff]  ;;  %v30_v6 = vld [vmem:[%s768_s1 + $0x18] sm:$0xff]  ;;  %v76_v33 = vshrl.u32 %v75_v30, 7 }
   0x3   :  { %v139_v8 = vld [vmem:[%s769_s2] sm:$0xff]  ;;  %v140_v9 = vld [vmem:[%s769_s2 + $0x8] sm:$0xff]  ;;  %v142_v11 = vld [vmem:[%s769_s2 + $0x18] sm:$0xff] }
   0x4   :  { %v32_v10 = vld [vmem:[%s768_s1 + $0x28] sm:$0xff]  ;;  %v211_v13 = vld [vmem:[%s770_s4] sm:$0xff]  ;;  %v141_v14 = vld [vmem:[%s769_s2 + $0x10] sm:$0xff]  ;;  %v121_v36 = vsub.s32 1, %v76_v33  ;;  %v77_v37 = vsub.s32 0, %v76_v33 }
   0x5   :  { %v144_v12 = vld [vmem:[%s769_s2 + $0x28] sm:$0xff]  ;;  %v213_v15 = vld [vmem:[%s770_s4 + $0x10] sm:$0xff]  ;;  %v215_v16 = vld [vmem:[%s770_s4 + $0x20] sm:$0xff] }
   0x6   :  { %104 = vperm.xlu0 %598, %v31_v3   ;;  %92 = vperm.xlu1 %596, %v28_v4   ;;  %v34_v17 = vld [vmem:[%s768_s1 + $0x38] sm:$0xff]  ;;  %v217_v18 = vld [vmem:[%s770_s4 + $0x30] sm:$0xff]  ;;  %v398_v19 = vld [vmem:[%s771_s6] sm:$0x3] }
   0x7   :  { %v143_v20 = vld [vmem:[%s769_s2 + $0x20] sm:$0xff]  ;;  %v145_v21 = vld [vmem:[%s769_s2 + $0x30] sm:$0xff]  ;;  %v146_v22 = vld [vmem:[%s769_s2 + $0x38] sm:$0xff] }
   0x8   :  { %v212_v23 = vld [vmem:[%s770_s4 + $0x8] sm:$0xff]  ;;  %v214_v24 = vld [vmem:[%s770_s4 + $0x18] sm:$0xff]  ;;  %v203_v25 = vld [vmem:[%s772_s3] sm:$0xff] }
   0x9   :  { %v216_v26 = vld [vmem:[%s770_s4 + $0x28] sm:$0xff]  ;;  %532 = vmatprep.mubr.msk.f32.mxu0 %vm259_vm0, %v203_v25  ;;  %v218_v27 = vld [vmem:[%s770_s4 + $0x38] sm:$0xff]  ;;  %v26_v38 = vld [vmem:[%s773_s0] sm:$0x3] }
   0xa   :  { %112 = vperm.xlu0 %598, %v33_v5   ;;  %597 = vset.pattern.permute.xlu1 %v607_v7  ;;  %v122_v41 = vrot.slane %v26_v38, %v121_v36  ;;  %v78_v42 = vrot.slane %v26_v38, %v77_v37 }
   0xb   :  { %52 = vperm.xlu1 %597, %v30_v6  }
   0xe   :  { %603 = vset.pattern.permute.xlu0 %v607_v7 }
   0xf   :  { %37 = vperm.xlu0 %603, %v27_v2   ;;  %599 = vset.pattern.permute.xlu1 %v606_v0 }
  0x10   :  { %100 = vperm.xlu1 %599, %v30_v6  }
  0x13   :  { %42 = vperm.xlu0 %603, %v28_v4  }
  0x14   :  { %600 = vset.pattern.permute.xlu1 %v607_v7 }
  0x15   :  { %149 = vperm.xlu1 %600, %v139_v8  }
  0x17   :  { %47 = vperm.xlu0 %603, %v29_v1  }
  0x19   :  { %57 = vperm.xlu1 %600, %v31_v3  }
  0x1b   :  { %154 = vperm.xlu0 %603, %v140_v9  }
  0x1d   :  { %62 = vperm.xlu1 %600, %v32_v10  }
  0x1f   :  { %164 = vperm.xlu0 %603, %v142_v11  }
  0x21   :  { %601 = vset.pattern.permute.xlu1 %v606_v0 }
  0x22   :  { %108 = vperm.xlu1 %601, %v32_v10  }
  0x23   :  { %174 = vperm.xlu0 %603, %v144_v12  }
  0x26   :  { %602 = vset.pattern.permute.xlu1 %v607_v7 }
  0x27   :  { %221 = vperm.xlu0 %603, %v211_v13   ;;  %159 = vperm.xlu1 %602, %v141_v14  }
  0x2b   :  { %231 = vperm.xlu0 %603, %v213_v15   ;;  %67 = vperm.xlu1 %602, %v33_v5  }
  0x2f   :  { %241 = vperm.xlu0 %603, %v215_v16   ;;  %72 = vperm.xlu1 %602, %v34_v17  }
  0x33   :  { %251 = vperm.xlu0 %603, %v217_v18   ;;  %604 = vset.pattern.permute.xlu1 %v606_v0 }
  0x34   :  { %116 = vperm.xlu1 %604, %v34_v17  }
  0x37   :  { %401 = vperm.xlu0 %603, %v398_v19  }
  0x38   :  { %605 = vset.pattern.permute.xlu1 %v607_v7 }
  0x39   :  { %169 = vperm.xlu1 %605, %v143_v20  }
  0x3d   :  { %179 = vperm.xlu1 %605, %v145_v21  }
  0x41   :  { %184 = vperm.xlu1 %605, %v146_v22  }
  0x45   :  { %226 = vperm.xlu1 %605, %v212_v23  }
  0x49   :  { %236 = vperm.xlu1 %605, %v214_v24  }
  0x4d   :  { %246 = vperm.xlu1 %605, %v216_v26  }
  0x51   :  { %256 = vperm.xlu1 %605, %v218_v27  }
  0x81   :  { %v89_v28 = vpop.permute.xlu1 %88  ;;  %v97_v29 = vpop.permute.xlu0 %96 }
  0x82   :  { %v123_v46 = vmul.f32 %v122_v41, %v89_v28  ;;  %v125_v61 = vmul.f32 %v122_v41, %v97_v29 }
  0x85   :  { %v93_v31 = vpop.permute.xlu1 %92  ;;  %v105_v32 = vpop.permute.xlu0 %104 }
  0x86   :  { %v124_v49 = vmul.f32 %v122_v41, %v93_v31  ;;  %v127_v14 = vmul.f32 %v122_v41, %v105_v32 }
  0x89   :  { %v113_v34 = vpop.permute.xlu0 %112 }
  0x8a   :  { %v53_v35 = vpop.permute.xlu1 %52  ;;  %v129_v24 = vmul.f32 %v122_v41, %v113_v34  ;;  %v204_v34 = vld [vmem:[%s772_s3 + $0x8] sm:$0xff] }
  0x8b   :  { %v82_v62 = vmul.f32 %v78_v42, %v53_v35 }
  0x8e   :  { %v38_v39 = vpop.permute.xlu0 %37 }
  0x8f   :  { %v101_v40 = vpop.permute.xlu1 %100  ;;  %v79_v44 = vmul.f32 %v78_v42, %v38_v39 }
  0x90   :  { %v126_v59 = vmul.f32 %v122_v41, %v101_v40  ;;  %v205_v40 = vld [vmem:[%s772_s3 + $0x10] sm:$0xff] }
  0x91   :  { %v131_v50 = vadd.f32 %v123_v46, %v79_v44  ;;  %v209_v44 = vld [vmem:[%s772_s3 + $0x30] sm:$0xff]  ;;  %v608_v46 = vmov 0.0|0.0  }
  0x92   :  { %v43_v43 = vpop.permute.xlu0 %42  ;;  %v134_v2 = vadd.f32 %v126_v59, %v82_v62  ;;  %579 = vmatprep.subr.bf16.mxu1 %v608_v46 }
  0x93   :  { %v80_v47 = vmul.f32 %v78_v42, %v43_v43  ;;  %v208_v43 = vld [vmem:[%s772_s3 + $0x28] sm:$0xff] }
  0x94   :  { %v150_v45 = vpop.permute.xlu1 %149 }
  0x95   :  { %v187_v52 = vadd.f32 %v150_v45, %v131_v50  ;;  %v132_v53 = vadd.f32 %v124_v49, %v80_v47  ;;  %v210_v45 = vld [vmem:[%s772_s3 + $0x38] sm:$0xff]  ;;  %v610_v47 = vmov 0.0  }
  0x96   :  { %v48_v48 = vpop.permute.xlu0 %47  ;;  %560 = vmatprep.mubr.msk.f32.mxu1 %vm609_vm1, %v610_v47 }
  0x97   :  { %v195_v57 = vmax.f32 %v187_v52, 0.0  ;;  %v81_v63 = vmul.f32 %v78_v42, %v48_v48 }
  0x98   :  { %v58_v51 = vpop.permute.xlu1 %57 }
  0x99   :  { %v133_v4 = vadd.f32 %v125_v61, %v81_v63  ;;  %v83_v15 = vmul.f32 %v78_v42, %v58_v51 }
  0x9a   :  { %v155_v54 = vpop.permute.xlu0 %154 }
  0x9b   :  { %v188_v55 = vadd.f32 %v155_v54, %v132_v53  ;;  %v135_v20 = vadd.f32 %v127_v14, %v83_v15 }
  0x9c   :  { %v63_v56 = vpop.permute.xlu1 %62 }
  0x9d   :  { %v196_v58 = vmax.f32 %v188_v55, 0.0  ;;  %v84_v13 = vmul.f32 %v78_v42, %v63_v56 }
  0x9e   :  { %v165_v1 = vpop.permute.xlu0 %164 }
  0x9f   :  { %v563_v60 = vpack.c.bf16 %v196_v58, %v195_v57  ;;  %v190_v3 = vadd.f32 %v165_v1, %v134_v2 }
  0xa1   :  { %v109_v0 = vpop.permute.xlu1 %108  ;;  %564 = vmatprep.subr.bf16.mxu0 %v563_v60  ;;  %v198_v7 = vmax.f32 %v190_v3, 0.0 }
  0xa2   :  { %566 = vmatpush3.bf16.msra.mxu0 %v563_v60  ;;  %v128_v12 = vmul.f32 %v122_v41, %v109_v0  ;;  %v175_v18 = vpop.permute.xlu0 %174 }
  0xa4   :  { %v136_v16 = vadd.f32 %v128_v12, %v84_v13 }
  0xa6   :  { %v160_v5 = vpop.permute.xlu1 %159  ;;  %v192_v19 = vadd.f32 %v175_v18, %v136_v16  ;;  %v222_v49 = vpop.permute.xlu0 %221 }
  0xa7   :  { %v189_v6 = vadd.f32 %v160_v5, %v133_v4 }
  0xa8   :  { %v200_v25 = vmax.f32 %v192_v19, 0.0 }
  0xa9   :  { %v197_v8 = vmax.f32 %v189_v6, 0.0 }
  0xaa   :  { %v68_v9 = vpop.permute.xlu1 %67  ;;  %v232_v52 = vpop.permute.xlu0 %231 }
  0xab   :  { %v567_v10 = vpack.c.bf16 %v198_v7, %v197_v8  ;;  %v85_v22 = vmul.f32 %v78_v42, %v68_v9 }
  0xad   :  { %568 = vmatprep.subr.bf16.mxu0 %v567_v10  ;;  %v137_v31 = vadd.f32 %v129_v24, %v85_v22 }
  0xae   :  { %v73_v11 = vpop.permute.xlu1 %72  ;;  %570 = vmatpush3.bf16.msra.mxu0 %v567_v10  ;;  %v242_v0 = vpop.permute.xlu0 %241 }
  0xaf   :  { %v86_v29 = vmul.f32 %v78_v42, %v73_v11  ;;  %v207_v42 = vld [vmem:[%s772_s3 + $0x20] sm:$0xff] }
  0xb2   :  { %v252_v12 = vpop.permute.xlu0 %251 }
  0xb3   :  { %v117_v17 = vpop.permute.xlu1 %116 }
  0xb4   :  { %v130_v26 = vmul.f32 %v122_v41, %v117_v17  ;;  %v206_v41 = vld [vmem:[%s772_s3 + $0x18] sm:$0xff] }
  0xb6   :  { %v138_v32 = vadd.f32 %v130_v26, %v86_v29 }
  0xb8   :  { %v170_v21 = vpop.permute.xlu1 %169 }
  0xb9   :  { %v191_v23 = vadd.f32 %v170_v21, %v135_v20  ;;  %v397_v20 = vld [vmem:[%s774_s5] sm:$0x3]  ;;  %v402_v21 = vpop.permute.xlu0 %401 }
  0xbb   :  { %v199_v27 = vmax.f32 %v191_v23, 0.0 }
  0xbc   :  { %v180_v28 = vpop.permute.xlu1 %179 }
  0xbd   :  { %v571_v30 = vpack.c.bf16 %v200_v25, %v199_v27  ;;  %v193_v33 = vadd.f32 %v180_v28, %v137_v31 }
  0xbf   :  { %572 = vmatprep.subr.bf16.mxu0 %v571_v30  ;;  %v201_v37 = vmax.f32 %v193_v33, 0.0 }
  0xc0   :  { %v185_v35 = vpop.permute.xlu1 %184  ;;  %574 = vmatpush3.bf16.msra.mxu0 %v571_v30 }
  0xc1   :  { %v194_v36 = vadd.f32 %v185_v35, %v138_v32 }
  0xc3   :  { %v202_v38 = vmax.f32 %v194_v36, 0.0 }
  0xc4   :  { %v227_v48 = vpop.permute.xlu1 %226 }
  0xc5   :  { %v575_v39 = vpack.c.bf16 %v202_v38, %v201_v37 }
  0xc7   :  { %576 = vmatprep.subr.bf16.mxu0 %v575_v39 }
  0xc8   :  { %578 = vmatpush3.bf16.msra.mxu0 %v575_v39  ;;  %v237_v50 = vpop.permute.xlu1 %236 }
  0xcb   :  { %533 = vmatmul.mubr.msk.f32.vlgmr.msra.gmra.mrb[0].mxu0 %vm259_vm0, %v204_v34 }
  0xcc   :  { %535 = vmatprep.mubr.msk.f32.mxu0 %vm259_vm0, %v205_v40  ;;  %v247_v61 = vpop.permute.xlu1 %246 }
  0xcf   :  { %536 = vmatmul.mubr.msk.f32.gmra.mrb[2].mxu0 %vm259_vm0, %v206_v41 }
  0xd0   :  { %538 = vmatprep.mubr.msk.f32.mxu0 %vm259_vm0, %v207_v42  ;;  %v257_v9 = vpop.permute.xlu1 %256 }
  0xd3   :  { %539 = vmatmul.mubr.msk.f32.gmra.mrb[4].mxu0 %vm259_vm0, %v208_v43 }
  0xd4   :  { %541 = vmatprep.mubr.msk.f32.mxu0 %vm259_vm0, %v209_v44 }
  0xd7   :  { %542 = vmatmul.mubr.msk.f32.gmra.mrb[6].mxu0 %vm259_vm0, %v210_v45 }
 0x19e   :  { %v534_v51 = vpop.f32.mrb[0].mxu0 }
 0x19f   :  { %v356_v53 = vadd.f32 %v534_v51, %v227_v48  ;;  %v350_v54 = vpop.f32.mrb[1].mxu0 }
 0x1a0   :  { %v351_v55 = vadd.f32 %v350_v54, %v222_v49 }
 0x1a1   :  { %v390_v56 = vmax.f32 %v356_v53, 0.0 }
 0x1a2   :  { %v389_v57 = vmax.f32 %v351_v55, 0.0  ;;  %v537_v58 = vpop.f32.mrb[2].mxu0 }
 0x1a3   :  { %v366_v59 = vadd.f32 %v537_v58, %v237_v50  ;;  %v360_v60 = vpop.f32.mrb[3].mxu0 }
 0x1a4   :  { %v361_v62 = vadd.f32 %v360_v60, %v232_v52  ;;  %v580_v63 = vpack.c.bf16 %v390_v56, %v389_v57 }
 0x1a5   :  { %v392_v1 = vmax.f32 %v366_v59, 0.0 }
 0x1a6   :  { %v391_v2 = vmax.f32 %v361_v62, 0.0  ;;  %v540_v3 = vpop.f32.mrb[4].mxu0  ;;  %581 = vmatpush3.bf16.msra.mxu1 %v580_v63 }
 0x1a7   :  { %v376_v4 = vadd.f32 %v540_v3, %v247_v61  ;;  %v370_v5 = vpop.f32.mrb[5].mxu0  ;;  %582 = vmatprep.subr.bf16.mxu1 %v608_v46 }
 0x1a8   :  { %v583_v6 = vpack.c.bf16 %v392_v1, %v391_v2  ;;  %v371_v7 = vadd.f32 %v370_v5, %v242_v0 }
 0x1a9   :  { %v394_v8 = vmax.f32 %v376_v4, 0.0 }
 0x1aa   :  { %v393_v10 = vmax.f32 %v371_v7, 0.0  ;;  %v543_v11 = vpop.f32.mrb[6].mxu0  ;;  %584 = vmatpush3.bf16.msra.mxu1 %v583_v6 }
 0x1ab   :  { %v386_v13 = vadd.f32 %v543_v11, %v257_v9  ;;  %v380_v14 = vpop.f32.mrb[7].mxu0  ;;  %585 = vmatprep.subr.bf16.mxu1 %v608_v46 }
 0x1ac   :  { %v586_v15 = vpack.c.bf16 %v394_v8, %v393_v10  ;;  %v381_v16 = vadd.f32 %v380_v14, %v252_v12 }
 0x1ad   :  { %v396_v17 = vmax.f32 %v386_v13, 0.0 }
 0x1ae   :  { %v395_v18 = vmax.f32 %v381_v16, 0.0  ;;  %587 = vmatpush3.bf16.msra.mxu1 %v586_v15 }
 0x1af   :  { %588 = vmatprep.subr.bf16.mxu1 %v608_v46 }
 0x1b0   :  { %v589_v19 = vpack.c.bf16 %v396_v17, %v395_v18 }
 0x1b2   :  { %590 = vmatpush3.bf16.msra.mxu1 %v589_v19 }
 0x1b5   :  { %561 = vmatmul.mubr.msk.f32.vlgmr.msra.gmra.mrb[0].mxu1 %vm259_vm0, %v397_v20 }
 0x288   :  { %v473_v22 = vpop.f32.mrb[0].mxu1 }
 0x289   :  { %v474_v23 = vadd.f32 %v473_v22, %v402_v21  ;;  %v562_v24 = vpop.f32.mrb[1].mxu1 }
 0x28b   :  { %477 = vst [vmem:[%s775_s7] sm:$0x3] %v474_v23 }

</bundles_post_ra>
